<compile_context>
chip_gen: v5e
topology: v5e:2x2
jax: 0.10.0
libtpu: 0.0.40
codegen_flags: <defaults>
</compile_context>

<pallas_src>
import jax
import jax.numpy as jnp
from jax.experimental import pallas as pl
from jax.experimental.pallas import tpu as pltpu


def _round_up(x, m):
    return ((x + m - 1) // m) * m


def mlp_kernel(x_ref, w1_ref, b1_ref, w2_ref, b2_ref, o_ref, acc_ref):
    # x_ref:  (tm, D)   compute dtype (bf16/f32)
    # w1_ref: (D, th)   compute dtype
    # b1_ref: (1, th)   f32
    # w2_ref: (th, D)   compute dtype
    # b2_ref: (1, D)    f32
    # o_ref:  (tm, D)   output dtype
    # acc_ref:(tm, D)   f32 VMEM accumulator (resident across the H axis)
    k = pl.program_id(1)

    @pl.when(k == 0)
    def _init():
        # Add b_proj exactly once (accumulator init), not once per H tile.
        acc_ref[...] = jnp.broadcast_to(
            b2_ref[...].astype(jnp.float32), acc_ref.shape)

    # c_fc slice: (tm, D) @ (D, th) -> f32 (MXU), then bias.
    h = jnp.dot(x_ref[...], w1_ref[...], preferred_element_type=jnp.float32)
    h = h + b1_ref[...].astype(jnp.float32)

    # GELU(approximate='tanh') in f32: 0.5*h*(1+tanh(sqrt(2/pi)*(h+0.044715*h^3)))
    c = 0.7978845608028654  # sqrt(2/pi)
    g = 0.5 * h * (1.0 + jnp.tanh(c * (h + 0.044715 * (h * h * h))))

    # c_proj partial: (tm, th) @ (th, D) accumulated in f32 (MXU).
    acc_ref[...] += jnp.dot(g.astype(w2_ref.dtype), w2_ref[...],
                            preferred_element_type=jnp.float32)

    @pl.when(k == pl.num_programs(1) - 1)
    def _finalize():
        o_ref[...] = acc_ref[...].astype(o_ref.dtype)


def mlp_pallas(x, w1, b1, w2, b2, *, tm=256, th=512,
               compute_dtype=jnp.bfloat16):
    """x: (B, T, D). w1: (D, H), b1: (H,), w2: (H, D), b2: (D,)."""
    B, T, D = x.shape
    H = w1.shape[1]
    M = B * T

    # Token tile: as large as possible for MXU row utilisation, but no larger
    # than the (8-row aligned) token count. Pad tokens up to a tile multiple.
    tm = min(tm, _round_up(M, 8))
    M_pad = _round_up(M, tm)

    # Hidden-reduction tile (multiple of 128; clamp for tiny configs).
    th = min(th, H)
    assert H % th == 0, "hidden dim must be divisible by the H tile"

    x2d = x.reshape(M, D)
    if M_pad != M:
        x2d = jnp.pad(x2d, ((0, M_pad - M), (0, 0)))

    # bf16 (or f32) MXU operands; biases stay f32 (added on the f32 side).
    x2d = x2d.astype(compute_dtype)
    w1c = w1.astype(compute_dtype)
    w2c = w2.astype(compute_dtype)
    b1_2d = b1.reshape(1, H).astype(jnp.float32)
    b2_2d = b2.reshape(1, D).astype(jnp.float32)

    grid = (M_pad // tm, H // th)

    out = pl.pallas_call(
        mlp_kernel,
        out_shape=jax.ShapeDtypeStruct((M_pad, D), x.dtype),
        grid_spec=pltpu.PrefetchScalarGridSpec(
            num_scalar_prefetch=0,
            grid=grid,
            in_specs=[
                pl.BlockSpec((tm, D), lambda i, k: (i, 0)),   # x tile (token)
                pl.BlockSpec((D, th), lambda i, k: (0, k)),   # W_fc tile
                pl.BlockSpec((1, th), lambda i, k: (0, k)),   # b_fc tile
                pl.BlockSpec((th, D), lambda i, k: (k, 0)),   # W_proj tile
                pl.BlockSpec((1, D), lambda i, k: (0, 0)),    # b_proj
            ],
            out_specs=pl.BlockSpec((tm, D), lambda i, k: (i, 0)),
            scratch_shapes=[pltpu.VMEM((tm, D), jnp.float32)],
        ),
        compiler_params=pltpu.CompilerParams(
            dimension_semantics=("parallel", "arbitrary"),
            vmem_limit_bytes=64 * 1024 * 1024,
        ),
    )(x2d, w1c, b1_2d, w2c, b2_2d)

    return out[:M].reshape(B, T, D)


def mlp_ref(x, w1, b1, w2, b2):
    h = jnp.einsum("btd,dh->bth", x, w1) + b1
    g = 0.5 * h * (1.0 + jnp.tanh(0.7978845608028654 * (h + 0.044715 * h ** 3)))
    return jnp.einsum("bth,hd->btd", g, w2) + b2


if __name__ == "__main__":
    # Small GPT-like config: n_embd=128 -> hidden=512, batch=2, seq=8.
    B, T, D = 2, 8, 128
    H = 4 * D

    key = jax.random.PRNGKey(0)
    kx, k1, k2, k3, k4 = jax.random.split(key, 5)

    x = jax.random.normal(kx, (B, T, D), dtype=jnp.float32)
    # Deterministic param init (shapes match nn.Linear: stored transposed as (in, out)).
    w_fc = jax.random.normal(k1, (D, H), dtype=jnp.float32) * 0.02
    b_fc = jax.random.normal(k2, (H,), dtype=jnp.float32) * 0.02
    w_proj = jax.random.normal(k3, (H, D), dtype=jnp.float32) * 0.02
    b_proj = jax.random.normal(k4, (D,), dtype=jnp.float32) * 0.02

    y_ref = mlp_ref(x, w_fc, b_fc, w_proj, b_proj)

    # f32 operands with th=128 -> exercises the H-reduction accumulator path.
    y_f32 = mlp_pallas(x, w_fc, b_fc, w_proj, b_proj,
                       th=128, compute_dtype=jnp.float32)
    y_f32 = jax.block_until_ready(y_f32)
    assert y_f32.shape == (B, T, D)
    assert jnp.allclose(y_f32, y_ref, atol=1e-4, rtol=1e-4)

    # bf16 MXU operands (production path on v6e/v7x), f32 GELU + f32 accum.
    y_bf16 = mlp_pallas(x, w_fc, b_fc, w_proj, b_proj,
                        compute_dtype=jnp.bfloat16)
    y_bf16 = jax.block_until_ready(y_bf16)
    assert y_bf16.shape == (B, T, D)
    assert jnp.allclose(y_bf16, y_ref, atol=2e-2, rtol=2e-2)

    print("KERNEL_OK")
</pallas_src>

<mosaic_0001>
module attributes {stable_mosaic.version = 11 : i64} {
  func.func @mlp_kernel(%arg0: i32, %arg1: i32, %arg2: memref<16x128xf32, #tpu.memory_space<vmem>>, %arg3: memref<128x128xf32, #tpu.memory_space<vmem>>, %arg4: memref<1x128xf32, #tpu.memory_space<vmem>>, %arg5: memref<128x128xf32, #tpu.memory_space<vmem>>, %arg6: memref<1x128xf32, #tpu.memory_space<vmem>>, %arg7: memref<16x128xf32, #tpu.memory_space<vmem>>, %arg8: memref<16x128xf32, #tpu.memory_space<vmem>>) attributes {dimension_semantics = [#tpu.dimension_semantics<parallel>, #tpu.dimension_semantics<arbitrary>], iteration_bounds = array<i64: 1, 4>, scalar_prefetch = 0 : i64, scratch_operands = 1 : i64, tpu.core_type = #tpu.core_type<tc>, window_params = [{transform_indices = @transform_0, window_bounds = array<i64: 16, 128>}, {transform_indices = @transform_1, window_bounds = array<i64: 128, 128>}, {transform_indices = @transform_2, window_bounds = array<i64: 1, 128>}, {transform_indices = @transform_3, window_bounds = array<i64: 128, 128>}, {pipeline_mode = #tpu.pipeline_mode<synchronous>, transform_indices = @transform_4, window_bounds = array<i64: 1, 128>}, {transform_indices = @transform_5, window_bounds = array<i64: 16, 128>}]} {
    %c0_i32 = arith.constant 0 : i32
    %0 = arith.cmpi eq, %arg1, %c0_i32 : i32
    %1 = arith.extui %0 : i1 to i32
    %c0_i32_0 = arith.constant 0 : i32
    %2 = arith.cmpi ne, %1, %c0_i32_0 : i32
    scf.if %2 {
      %c0_18 = arith.constant 0 : index
      %c0_19 = arith.constant 0 : index
      %30 = vector.load %arg6[%c0_18, %c0_19] : memref<1x128xf32, #tpu.memory_space<vmem>>, vector<1x128xf32>
      %31 = vector.shape_cast %30 : vector<1x128xf32> to vector<1x128xf32>
      %32 = vector.broadcast %31 : vector<1x128xf32> to vector<16x128xf32>
      %c0_20 = arith.constant 0 : index
      %c0_21 = arith.constant 0 : index
      %33 = vector.load %arg8[%c0_20, %c0_21] : memref<16x128xf32, #tpu.memory_space<vmem>>, vector<16x128xf32>
      tpu.vector_store %arg8[%c0_20, %c0_21], %32 {strides = array<i32>} : memref<16x128xf32, #tpu.memory_space<vmem>>, vector<16x128xf32>,
    } else {
    }
    %c0 = arith.constant 0 : index
    %c0_1 = arith.constant 0 : index
    %3 = vector.load %arg2[%c0, %c0_1] : memref<16x128xf32, #tpu.memory_space<vmem>>, vector<16x128xf32>
    %c0_2 = arith.constant 0 : index
    %c0_3 = arith.constant 0 : index
    %4 = vector.load %arg3[%c0_2, %c0_3] : memref<128x128xf32, #tpu.memory_space<vmem>>, vector<128x128xf32>
    %cst = arith.constant dense<0.000000e+00> : vector<16x128xf32>
    %5 = tpu.matmul %3, %4, %cst {dimension_numbers = #tpu.dot_dimension_numbers<[1], [0], [0], [1], [0, 0, 1, 1], [], []>} : vector<16x128xf32>, vector<128x128xf32>, vector<16x128xf32> -> vector<16x128xf32>
    %c0_4 = arith.constant 0 : index
    %c0_5 = arith.constant 0 : index
    %6 = vector.load %arg4[%c0_4, %c0_5] : memref<1x128xf32, #tpu.memory_space<vmem>>, vector<1x128xf32>
    %7 = vector.broadcast %6 : vector<1x128xf32> to vector<16x128xf32>
    %8 = arith.addf %5, %7 : vector<16x128xf32>
    %cst_6 = arith.constant 5.000000e-01 : f32
    %9 = vector.broadcast %cst_6 : f32 to vector<16x128xf32>
    %10 = arith.mulf %9, %8 : vector<16x128xf32>
    %11 = arith.mulf %8, %8 : vector<16x128xf32>
    %12 = arith.mulf %11, %8 : vector<16x128xf32>
    %cst_7 = arith.constant 4.471500e-02 : f32
    %13 = vector.broadcast %cst_7 : f32 to vector<16x128xf32>
    %14 = arith.mulf %13, %12 : vector<16x128xf32>
    %15 = arith.addf %8, %14 : vector<16x128xf32>
    %cst_8 = arith.constant 0.797884583 : f32
    %16 = vector.broadcast %cst_8 : f32 to vector<16x128xf32>
    %17 = arith.mulf %16, %15 : vector<16x128xf32>
    %18 = math.tanh %17 : vector<16x128xf32>
    %cst_9 = arith.constant 1.000000e+00 : f32
    %19 = vector.broadcast %cst_9 : f32 to vector<16x128xf32>
    %20 = arith.addf %19, %18 : vector<16x128xf32>
    %21 = arith.mulf %10, %20 : vector<16x128xf32>
    %c0_10 = arith.constant 0 : index
    %c0_11 = arith.constant 0 : index
    %22 = vector.load %arg8[%c0_10, %c0_11] : memref<16x128xf32, #tpu.memory_space<vmem>>, vector<16x128xf32>
    %c0_12 = arith.constant 0 : index
    %c0_13 = arith.constant 0 : index
    %23 = vector.load %arg5[%c0_12, %c0_13] : memref<128x128xf32, #tpu.memory_space<vmem>>, vector<128x128xf32>
    %cst_14 = arith.constant dense<0.000000e+00> : vector<16x128xf32>
    %24 = tpu.matmul %21, %23, %cst_14 {dimension_numbers = #tpu.dot_dimension_numbers<[1], [0], [0], [1], [0, 0, 1, 1], [], []>} : vector<16x128xf32>, vector<128x128xf32>, vector<16x128xf32> -> vector<16x128xf32>
    %25 = arith.addf %22, %24 : vector<16x128xf32>
    %c0_15 = arith.constant 0 : index
    %c0_16 = arith.constant 0 : index
    %26 = vector.load %arg8[%c0_15, %c0_16] : memref<16x128xf32, #tpu.memory_space<vmem>>, vector<16x128xf32>
    tpu.vector_store %arg8[%c0_15, %c0_16], %25 {strides = array<i32>} : memref<16x128xf32, #tpu.memory_space<vmem>>, vector<16x128xf32>,
    %c3_i32 = arith.constant 3 : i32
    %27 = arith.cmpi eq, %arg1, %c3_i32 : i32
    %28 = arith.extui %27 : i1 to i32
    %c0_i32_17 = arith.constant 0 : i32
    %29 = arith.cmpi ne, %28, %c0_i32_17 : i32
    scf.if %29 {
      %c0_18 = arith.constant 0 : index
      %c0_19 = arith.constant 0 : index
      %30 = vector.load %arg8[%c0_18, %c0_19] : memref<16x128xf32, #tpu.memory_space<vmem>>, vector<16x128xf32>
      %c0_20 = arith.constant 0 : index
      %c0_21 = arith.constant 0 : index
      %31 = vector.load %arg7[%c0_20, %c0_21] : memref<16x128xf32, #tpu.memory_space<vmem>>, vector<16x128xf32>
      tpu.vector_store %arg7[%c0_20, %c0_21], %30 {strides = array<i32>} : memref<16x128xf32, #tpu.memory_space<vmem>>, vector<16x128xf32>,
    } else {
    }
    return
  }
  func.func @transform_0(%arg0: i32, %arg1: i32) -> (i32, i32) {
    %c0_i32 = arith.constant 0 : i32
    %c0_i32_0 = arith.constant 0 : i32
    return %arg0, %c0_i32 : i32, i32
  }
  func.func @transform_1(%arg0: i32, %arg1: i32) -> (i32, i32) {
    %c0_i32 = arith.constant 0 : i32
    %c0_i32_0 = arith.constant 0 : i32
    return %c0_i32, %arg1 : i32, i32
  }
  func.func @transform_2(%arg0: i32, %arg1: i32) -> (i32, i32) {
    %c0_i32 = arith.constant 0 : i32
    %c0_i32_0 = arith.constant 0 : i32
    return %c0_i32, %arg1 : i32, i32
  }
  func.func @transform_3(%arg0: i32, %arg1: i32) -> (i32, i32) {
    %c0_i32 = arith.constant 0 : i32
    %c0_i32_0 = arith.constant 0 : i32
    return %arg1, %c0_i32 : i32, i32
  }
  func.func @transform_4(%arg0: i32, %arg1: i32) -> (i32, i32) {
    %c0_i32 = arith.constant 0 : i32
    %c0_i32_0 = arith.constant 0 : i32
    %c0_i32_1 = arith.constant 0 : i32
    return %c0_i32, %c0_i32_0 : i32, i32
  }
  func.func @transform_5(%arg0: i32, %arg1: i32) -> (i32, i32) {
    %c0_i32 = arith.constant 0 : i32
    %c0_i32_0 = arith.constant 0 : i32
    return %arg0, %c0_i32 : i32, i32
  }
}

</mosaic_0001>

<bundles_post_ra>
// kernel: tpu_custom_call.1
= control target key start
LH: loop header
LB: loop body
LE: loop exit
PB: predicated region body
PF: predicated region fallthrough
CT: control target
= control target key end

     0   :  { %s1205_s0 = inlined_call_operand.hbm [shape: f32[16,128], index: 0, kind: input, shape index: {}]   ;;  %s1206_s1 = inlined_call_operand.hbm [shape: f32[128,512], index: 1, kind: input, shape index: {}]   ;;  %s1207_s2 = inlined_call_operand.hbm [shape: f32[1,512], index: 2, kind: input, shape index: {}]   ;;  %s1208_s3 = inlined_call_operand.hbm [shape: f32[512,128], index: 3, kind: input, shape index: {}]   ;;  %s1209_s4 = inlined_call_operand.vmem [shape: f32[1,128], index: 4, kind: input, shape index: {}]   ;;  %s1210_s5 = inlined_call_operand.hbm [shape: f32[16,128], index: 5, kind: output, shape index: {}]  }
   0x1   :  { %1212 = sst [smem:[#allocation17_spill]] %s1205_s0 }
   0x2   :  { %1213 = sst [smem:[#allocation18_spill]] %s1206_s1 }
   0x3   :  { %1214 = sst [smem:[#allocation19_spill]] %s1207_s2 }
   0x4   :  { %10 = vsyncpa [#allocation4], 0 }
   0x5   :  { %11 = vsyncpa [#allocation7], 0 }
   0x6   :  { %13 = vsyncpa [#allocation7 + $0x1], 0 }
   0x7   :  { %14 = vsyncpa [#allocation10], 0 }
   0x8   :  { %16 = vsyncpa [#allocation10 + $0x1], 0 }
   0x9   :  { %17 = vsyncpa [#allocation5], 0  ;;  %s1000_s18 = smov 0   ;;  %s1002_s19 = smov 0  }
   0xa   :  { %s1004_s20 = smov 0   ;;  %s1006_s21 = smov 0  }
   0xb   :  { %s1008_s22 = smov 0   ;;  %s1010_s23 = smov 0  }
   0xc LB: > { %s32_s24 = sadd.s32 1, %s957_s22  ;;  %s68_s25 = sadd.s32 1, %s949_s20  ;;  %s961_s23 = sphi %s1010_s23, %s23_s23   ;;  %s957_s22 = sphi %s1008_s22, %s1228_s22   ;;  %s953_s21 = sphi %s1006_s21, %s1227_s21   ;;  %s949_s20 = sphi %s1004_s20, %s1226_s20   ;;  %s945_s19 = sphi %s1002_s19, %s1225_s19   ;;  %s941_s18 = sphi %s1000_s18, %s1224_s18  }
   0xd   : > { %p33_p0 = scmp.ge.s32.totalorder %s32_s24, 4  ;;  %p75_p1 = scmp.ne.s32.totalorder %s949_s20, %s945_s19 }
   0xe   : > { %p76_p2 = scmp.eq.s32.totalorder %s961_s23, 0  ;;  %p686_p5 = scmp.lt.s32.totalorder %s961_s23, 4 }
   0xf   : > { %s1230_s24 = smov (%p33_p0, %s32_s24), 0  ;;  %s224_s28 = sand.u32 1, %s961_s23  }
  0x10   : > { %1215 = sst [smem:[#allocation16_spill]] %s1230_s24  ;;  %p1037_p3 = por %p76_p2, %p75_p1 }
  0x11   : > { %s65_s27 = ssub.s32 %s957_s22, %s1230_s24  ;;  %s1046_s29 = sand.u32 1, %s949_s20  }
  0x12   : > { %p66_p4 = scmp.eq.s32.totalorder %s65_s27, 0  ;;  %s609_s6 = sshll.u32 %s1046_s29, 7 }
  0x13   : > { %s610_s7 = sshll.u32 %s957_s22, 3  ;;  %s1217_s1 = sld [smem:[#allocation18_spill]] }
  0x14   : > { %s1049_s30 = scalar_select %p66_p4, %s949_s20, %s68_s25  }
  0x15   : > { %s228_s11 = scalar_lea.vmem [#allocation6], %s609_s6  ;;  %p1060_p6 = pnand %p686_p5, %p1037_p3 }
  0x16   : > { %s235_s12 = sshll.u32 %s228_s11, 4  ;;  %s1064_s15 = scalar_lea.sflag [#allocation7], %s224_s28  ;;  %s236_s12 = int_to_ptr.vmem [resolvable:$true] %s235_s12 }
  0x17   : > { %s963_s16 = smov 512   ;;  %s964_s17 = smov 128  }
  0x18   : > { %s965_s25 = smov 8   ;;  %s1072_s27 = sadd.s32 4294967295, %s961_s23  }
  0x19   : > { %s232_s10 = scalar_lea.hbm %s1217_s1, %s610_s7  ;;  %p81_p7 = scmp.ne.s32.totalorder %s945_s19, %s941_s18 }
  0x1a   : > { %s233_s13 = sshll.u32 %s232_s10, 4  ;;  %p82_p8 = scmp.eq.s32.totalorder %s1072_s27, 0  ;;  %s234_s13 = int_to_ptr.hbm [resolvable:$true] %s233_s13 }
  0x1b   : > { %678 = dma.hbm_to_vmem [thread:$0]  (!%p1060_p6), %s234_s13, 2048, %s236_s12, %s1064_s15, %s963_s16, %s964_s17, %s965_s25  }
  0x1c   : > { %p606_p9 = scmp.ge.s32.totalorder %s961_s23, 1  ;;  %p191_p10 = scmp.lt.s32.totalorder %s961_s23, 5 }
  0x1d   : > { %p1081_p11 = por %p82_p8, %p81_p7  ;;  %s1220_s0 = sld [smem:[#allocation17_spill]] }
  0x1e   : > { %p1088_p12 = pnand %p606_p9, %p191_p10  ;;  %s966_s18 = smov [#allocation3]  }
  0x1f   : > { %s207_s10 = sshll.u32 %s966_s18, 4  ;;  %s1222_s2 = sld [smem:[#allocation19_spill]]  ;;  %s208_s10 = int_to_ptr.vmem [resolvable:$true] %s207_s10 }
  0x20   : > { %p671_p13 = pneg %p1088_p12  ;;  %s248_s28 = scalar_lea.vmem [#allocation8], %s1046_s29 }
  0x21   : > { %s255_s7 = sshll.u32 %s248_s28, 4  ;;  %s624_s18 = sshll.u32 %s957_s22, 7  ;;  %s256_s7 = int_to_ptr.vmem [resolvable:$true] %s255_s7 }
  0x22   : > { %p672_p0 = pnand %p671_p13, %p82_p8  ;;  %s263_s24 = scalar_lea.sflag [#allocation10], %s1046_s29 }
  0x23   : > { %s205_s8 = sshll.u32 %s1220_s0, 4  ;;  %s266_s0 = scalar_lea.vmem [#allocation9], %s609_s6  ;;  %s206_s8 = int_to_ptr.hbm [resolvable:$true] %s205_s8 }
  0x24   : > { %674 = dma.hbm_to_vmem [thread:$0]  (!%p672_p0), %s206_s8, 256, %s208_s10, [#allocation4], %s964_s17, %s964_s17, %s965_s25  }
  0x25   : > { %s251_s13 = scalar_lea.hbm %s1222_s2, %s957_s22  ;;  %s274_s11 = sshll.u32 %s266_s0, 4  ;;  %s275_s11 = int_to_ptr.vmem [resolvable:$true] %s274_s11 }
  0x26   : > { %s253_s16 = sshll.u32 %s251_s13, 4  ;;  %s271_s2 = scalar_lea.hbm %s1208_s3, %s624_s18  ;;  %s254_s16 = int_to_ptr.hbm [resolvable:$true] %s253_s16 }
  0x27   : > { %681 = dma.hbm_to_vmem [thread:$0]  (!%p1060_p6), %s254_s16, 16, %s256_s7, %s1064_s15  }
  0x28   : > { %s272_s13 = sshll.u32 %s271_s2, 4  ;;  %286 = sbr.rel (%p1088_p12) target bundleno = 399 (0x18f), region = 40  ;;  %s273_s13 = int_to_ptr.hbm [resolvable:$true] %s272_s13 }
  0x29   : > { %684 = dma.hbm_to_vmem [thread:$0]  (!%p1060_p6), %s273_s13, 2048, %s275_s11, %s263_s24, %s964_s17, %s964_s17, %s965_s25  }
  0x2d   : > { %924 = dma.done.wait (%p82_p8), [#allocation4], 256  }
  0x2e   : > { %926 = vsyncadd (%p82_p8), [#allocation4], 4294967040  ;;  %s293_s0 = sand.u32 1, %s1072_s27   ;;  %s1127_s1 = sand.u32 1, %s945_s19  }
  0x2f   : > { %s616_s2 = sshll.u32 %s1127_s1, 7  ;;  %s294_s29 = scalar_lea.sflag [#allocation7], %s293_s0 }
  0x30   : > { %s1130_s6 = scalar_lea.vmem [#allocation6], %s616_s2 }
  0x31   : > { %928 = dma.done.wait (%p1081_p11), %s294_s29, 2064  }
  0x32   : > { %930 = vsyncadd (%p1081_p11), %s294_s29, 4294965232  ;;  %s306_s24 = scalar_lea.vmem [#allocation8], %s1127_s1  ;;  %s313_s14 = scalar_lea.sflag [#allocation10], %s1127_s1 }
  0x33   : > { %s1138_s15 = scalar_lea.vmem [#allocation9], %s616_s2 }
  0x34   : > { %932 = dma.done.wait (%p1081_p11), %s313_s14, 2048  }
  0x35   : > { %934 = vsyncadd (%p1081_p11), %s313_s14, 4294965248  ;;  %p618_p1 = scmp.ne.s32.totalorder %s953_s21, 0 }
  0x37   : > { %354 = sbr.rel (%p618_p1) target bundleno = 63 (0x3f), region = 60 }
  0x3c   : > { %v745_v0 = vld [vmem:[%s1209_s4] ss:$0 sm:$0xff] }
  0x3d   : > { %359 = vst [vmem:[#allocation2] sm:$0xff] %v745_v0 }
  0x3e   : > { %360 = vst [vmem:[#allocation2 + $0x8] sm:$0xff] %v745_v0 }
  0x3f PF: > { %v378_v1 = vld [vmem:[%s1130_s6 + $0x78] sm:$0xff]  ;;  %v377_v2 = vld [vmem:[%s1130_s6 + $0x70] sm:$0xff]  ;;  %v376_v3 = vld [vmem:[%s1130_s6 + $0x68] sm:$0xff]  ;;  %p619_p2 = scmp.ne.s32.totalorder %s953_s21, 3 }
  0x40   : > { %383 = vmatpush.msra.mxu0 %v378_v1  ;;  %625 = vmatpush.msra.mxu2 %v378_v1  ;;  %v375_v4 = vld [vmem:[%s1130_s6 + $0x60] sm:$0xff]  ;;  %v374_v5 = vld [vmem:[%s1130_s6 + $0x58] sm:$0xff]  ;;  %v373_v8 = vld [vmem:[%s1130_s6 + $0x50] sm:$0xff] }
  0x41   : > { %v441_v6 = vld [vmem:[%s1138_s15 + $0x78] sm:$0xff]  ;;  %v440_v7 = vld [vmem:[%s1138_s15 + $0x70] sm:$0xff]  ;;  %v439_v9 = vld [vmem:[%s1138_s15 + $0x68] sm:$0xff] }
  0x42   : > { %384 = vmatpush.msra.mxu0 %v377_v2  ;;  %626 = vmatpush.msra.mxu2 %v377_v2  ;;  %v372_v10 = vld [vmem:[%s1130_s6 + $0x48] sm:$0xff]  ;;  %v371_v12 = vld [vmem:[%s1130_s6 + $0x40] sm:$0xff]  ;;  %v370_v13 = vld [vmem:[%s1130_s6 + $0x38] sm:$0xff] }
  0x43   : > { %442 = vmatpush.msra.mxu1 %v441_v6  ;;  %641 = vmatpush.msra.mxu3 %v441_v6  ;;  %v438_v11 = vld [vmem:[%s1138_s15 + $0x60] sm:$0xff]  ;;  %v369_v14 = vld [vmem:[%s1130_s6 + $0x30] sm:$0xff]  ;;  %v366_v17 = vld [vmem:[%s1130_s6 + $0x18] sm:$0xff] }
  0x44   : > { %385 = vmatpush.msra.mxu0 %v376_v3  ;;  %627 = vmatpush.msra.mxu2 %v376_v3  ;;  %v368_v15 = vld [vmem:[%s1130_s6 + $0x28] sm:$0xff]  ;;  %v367_v16 = vld [vmem:[%s1130_s6 + $0x20] sm:$0xff]  ;;  %v365_v18 = vld [vmem:[%s1130_s6 + $0x10] sm:$0xff] }
  0x45   : > { %443 = vmatpush.msra.mxu1 %v440_v7  ;;  %642 = vmatpush.msra.mxu3 %v440_v7  ;;  %v364_v19 = vld [vmem:[%s1130_s6 + $0x8] sm:$0xff]  ;;  %v363_v20 = vld [vmem:[%s1130_s6] sm:$0xff]  ;;  %v361_v21 = vld [vmem:[#allocation3] sm:$0xff] }
  0x46   : > { %386 = vmatpush.msra.mxu0 %v375_v4  ;;  %628 = vmatpush.msra.mxu2 %v375_v4  ;;  %v362_v22 = vld [vmem:[#allocation3 + $0x8] sm:$0xff]  ;;  %v435_v25 = vld [vmem:[%s1138_s15 + $0x48] sm:$0xff]  ;;  %v434_v26 = vld [vmem:[%s1138_s15 + $0x40] sm:$0xff] }
  0x47   : > { %444 = vmatpush.msra.mxu1 %v439_v9  ;;  %643 = vmatpush.msra.mxu3 %v439_v9  ;;  %v437_v23 = vld [vmem:[%s1138_s15 + $0x58] sm:$0xff]  ;;  %v436_v24 = vld [vmem:[%s1138_s15 + $0x50] sm:$0xff]  ;;  %v431_v29 = vld [vmem:[%s1138_s15 + $0x28] sm:$0xff] }
  0x48   : > { %387 = vmatpush.msra.mxu0 %v374_v5  ;;  %629 = vmatpush.msra.mxu2 %v374_v5  ;;  %v433_v27 = vld [vmem:[%s1138_s15 + $0x38] sm:$0xff]  ;;  %v432_v28 = vld [vmem:[%s1138_s15 + $0x30] sm:$0xff]  ;;  %v430_v30 = vld [vmem:[%s1138_s15 + $0x20] sm:$0xff] }
  0x49   : > { %445 = vmatpush.msra.mxu1 %v438_v11  ;;  %644 = vmatpush.msra.mxu3 %v438_v11  ;;  %v429_v31 = vld [vmem:[%s1138_s15 + $0x18] sm:$0xff]  ;;  %v428_v32 = vld [vmem:[%s1138_s15 + $0x10] sm:$0xff]  ;;  %v427_v33 = vld [vmem:[%s1138_s15 + $0x8] sm:$0xff] }
  0x4a   : > { %388 = vmatpush.msra.mxu0 %v373_v8  ;;  %630 = vmatpush.msra.mxu2 %v373_v8  ;;  %v426_v34 = vld [vmem:[%s1138_s15] sm:$0xff]  ;;  %v746_v35 = vld [vmem:[%s306_s24] ss:$0 sm:$0xff] }
  0x4b   : > { %446 = vmatpush.msra.mxu1 %v437_v23  ;;  %645 = vmatpush.msra.mxu3 %v437_v23  ;;  %v424_v58 = vld [vmem:[#allocation2] sm:$0xff]  ;;  %v425_v61 = vld [vmem:[#allocation2 + $0x8] sm:$0xff] }
  0x4c   : > { %389 = vmatpush.msra.mxu0 %v372_v10  ;;  %631 = vmatpush.msra.mxu2 %v372_v10 }
  0x4d   : > { %447 = vmatpush.msra.mxu1 %v436_v24  ;;  %646 = vmatpush.msra.mxu3 %v436_v24 }
  0x4e   : > { %390 = vmatpush.msra.mxu0 %v371_v12  ;;  %632 = vmatpush.msra.mxu2 %v371_v12 }
  0x4f   : > { %448 = vmatpush.msra.mxu1 %v435_v25  ;;  %647 = vmatpush.msra.mxu3 %v435_v25 }
  0x50   : > { %391 = vmatpush.msra.mxu0 %v370_v13  ;;  %633 = vmatpush.msra.mxu2 %v370_v13 }
  0x51   : > { %449 = vmatpush.msra.mxu1 %v434_v26  ;;  %648 = vmatpush.msra.mxu3 %v434_v26 }
  0x52   : > { %392 = vmatpush.msra.mxu0 %v369_v14  ;;  %634 = vmatpush.msra.mxu2 %v369_v14 }
  0x53   : > { %450 = vmatpush.msra.mxu1 %v433_v27  ;;  %649 = vmatpush.msra.mxu3 %v433_v27 }
  0x54   : > { %393 = vmatpush.msra.mxu0 %v368_v15  ;;  %635 = vmatpush.msra.mxu2 %v368_v15 }
  0x55   : > { %451 = vmatpush.msra.mxu1 %v432_v28  ;;  %650 = vmatpush.msra.mxu3 %v432_v28 }
  0x56   : > { %394 = vmatpush.msra.mxu0 %v367_v16  ;;  %636 = vmatpush.msra.mxu2 %v367_v16 }
  0x57   : > { %452 = vmatpush.msra.mxu1 %v431_v29  ;;  %651 = vmatpush.msra.mxu3 %v431_v29 }
  0x58   : > { %395 = vmatpush.msra.mxu0 %v366_v17  ;;  %637 = vmatpush.msra.mxu2 %v366_v17 }
  0x59   : > { %453 = vmatpush.msra.mxu1 %v430_v30  ;;  %652 = vmatpush.msra.mxu3 %v430_v30 }
  0x5a   : > { %396 = vmatpush.msra.mxu0 %v365_v18  ;;  %638 = vmatpush.msra.mxu2 %v365_v18 }
  0x5b   : > { %454 = vmatpush.msra.mxu1 %v429_v31  ;;  %653 = vmatpush.msra.mxu3 %v429_v31 }
  0x5c   : > { %397 = vmatpush.msra.mxu0 %v364_v19  ;;  %639 = vmatpush.msra.mxu2 %v364_v19 }
  0x5d   : > { %455 = vmatpush.msra.mxu1 %v428_v32  ;;  %654 = vmatpush.msra.mxu3 %v428_v32 }
  0x5e   : > { %398 = vmatpush.msra.mxu0 %v363_v20  ;;  %640 = vmatpush.msra.mxu2 %v363_v20 }
  0x5f   : > { %399 = vmatmul.f32.vlgmr.msra.gmra.mxu0 %v361_v21  ;;  %402 = vmatmul.f32.vlgmr.msra.gmra.mxu2 %v362_v22 }
  0x60   : > { %456 = vmatpush.msra.mxu1 %v427_v33  ;;  %655 = vmatpush.msra.mxu3 %v427_v33 }
  0x62   : > { %457 = vmatpush.msra.mxu1 %v426_v34  ;;  %656 = vmatpush.msra.mxu3 %v426_v34 }
  0xdc   : > { %v400_v36 = vpop.f32.mrf.mxu0 }
  0xdd   : > { %v401_v37 = vadd.f32 %v746_v35, %v400_v36 }
  0xdf   : > { %v408_v38 = vmul.f32 %v401_v37, %v401_v37  ;;  %v406_v51 = vmul.f32 0.5, %v401_v37 }
  0xe1   : > { %v410_v39 = vmul.f32 %v408_v38, %v401_v37 }
  0xe2   : > { %v403_v40 = vpop.f32.mrf.mxu2 }
  0xe3   : > { %v404_v41 = vadd.f32 %v746_v35, %v403_v40  ;;  %v412_v42 = vmul.f32 0.044715, %v410_v39 }
  0xe5   : > { %v409_v43 = vmul.f32 %v404_v41, %v404_v41  ;;  %v414_v44 = vadd.f32 %v412_v42, %v401_v37  ;;  %v407_v55 = vmul.f32 0.5, %v404_v41 }
  0xe7   : > { %v411_v45 = vmul.f32 %v409_v43, %v404_v41  ;;  %v416_v46 = vmul.f32 0.7978846, %v414_v44 }
  0xe9   : > { %747 = vtanh.f32 %v416_v46  ;;  %v413_v47 = vmul.f32 0.044715, %v411_v45 }
  0xeb   : > { %v415_v48 = vadd.f32 %v413_v47, %v404_v41 }
  0xed   : > { %v417_v49 = vmul.f32 0.7978846, %v415_v48 }
  0xef   : > { %v748_v50 = vpop.eup %747  ;;  %749 = vtanh.f32 %v417_v49 }
  0xf0   : > { %v420_v52 = vadd.f32 1.0, %v748_v50 }
  0xf2   : > { %v422_v53 = vmul.f32 %v420_v52, %v406_v51 }
  0xf4   : > { %458 = vmatmul.f32.vlgmr.msra.gmra.mxu1 %v422_v53 }
  0xf5   : > { %v750_v54 = vpop.eup %749 }
  0xf6   : > { %v421_v56 = vadd.f32 1.0, %v750_v54 }
  0xf8   : > { %v423_v57 = vmul.f32 %v421_v56, %v407_v55 }
  0xfa   : > { %461 = vmatmul.f32.vlgmr.msra.gmra.mxu3 %v423_v57 }
 0x171   : > { %v459_v59 = vpop.f32.mrf.mxu1 }
 0x172   : > { %v465_v60 = vadd.f32 %v459_v59, %v424_v58 }
 0x174   : > { %467 = vst [vmem:[#allocation2] sm:$0xff] %v465_v60 }
 0x17c   : > { %472 = sbr.rel (%p619_p2) target bundleno = 393 (0x189), region = 64 }
 0x17d   : > { %v462_v62 = vpop.f32.mrf.mxu3 }
 0x17e   : > { %v466_v63 = vadd.f32 %v462_v62, %v425_v61 }
 0x180   : > { %468 = vst [vmem:[#allocation2 + $0x8] sm:$0xff] %v466_v63 }
 0x181   : > { %v473_v0 = vld [vmem:[#allocation2] sm:$0xff] }
 0x182   : > { %475 = vst [vmem:[#allocation11] sm:$0xff] %v473_v0 }
 0x187   : > { %v474_v1 = vld [vmem:[#allocation2 + $0x8] sm:$0xff] }
 0x188   : > { %476 = vst [vmem:[#allocation11 + $0x8] sm:$0xff] %v474_v1 }
 0x189 PF: > { %p688_p3 = scmp.eq.s32.totalorder %s1072_s27, 3  ;;  %s487_s9 = sshll.u32 %s1210_s5, 4  ;;  %s488_s9 = int_to_ptr.hbm [resolvable:$true] %s487_s9 }
 0x18a   : > { %s967_s10 = smov [#allocation11]   ;;  %s968_s28 = smov 128  }
 0x18b   : > { %s485_s16 = sshll.u32 %s967_s10, 4  ;;  %s969_s7 = smov 8   ;;  %s486_s16 = int_to_ptr.vmem [resolvable:$true] %s485_s16 }
 0x18c   : > { %668 = dma.vmem_to_hbm [thread:$0]  (%p688_p3), %s486_s16, 256, %s488_s9, [#allocation5], %s968_s28, %s968_s28, %s969_s7  }
 0x18d   : > { %936 = dma.done.wait (%p688_p3), [#allocation5], 256  }
 0x18e   : > { %938 = vsyncadd (%p688_p3), [#allocation5], 4294967040 }
 0x18f PF: > { %s23_s23 = sadd.s32 1, %s961_s23   ;;  %s1223_s27 = sld [smem:[#allocation16_spill]] }
 0x190   : > { %p20_p4 = scmp.ge.s32.totalorder %s23_s23, 6   ;;  %s1224_s18 = smov %s945_s19 }
 0x191   : > { %s1225_s19 = smov %s949_s20  ;;  %s1226_s20 = smov %s1049_s30 }
 0x192   : > { %s1227_s21 = smov %s957_s22  ;;  %22 = sbr.rel (!%p20_p4) target bundleno = 12 (0xc), region = 116 }
 0x195   : > { %s1228_s22 = smov %s1223_s27 }
 0x197   :  { %504 = vsyncpa [#allocation4], 1 }
 0x198   :  { %506 = vsyncpa [#allocation4 + $0x1], 1 }
 0x199   :  { %507 = vsyncpa [#allocation7], 1 }
 0x19a   :  { %509 = vsyncpa [#allocation7 + $0x1], 1 }
 0x19b   :  { %510 = vsyncpa [#allocation10], 1 }
 0x19c   :  { %512 = vsyncpa [#allocation10 + $0x1], 1 }
 0x19d   :  { %513 = vsyncpa [#allocation5], 1 }
 0x19e   :  { %515 = vsyncpa [#allocation5 + $0x1], 1 }

</bundles_post_ra>
